<compile_context>
chip_gen: v7x
topology: tpu7x:2x2x1
jax: 0.10.0
libtpu: 0.0.40
codegen_flags: <defaults>
</compile_context>

<pallas_src>
import jax
import jax.numpy as jnp
from jax import lax
from jax.experimental import pallas as pl
from jax.experimental.pallas import tpu as pltpu


def _pick_row_block(h_out, w_out):
    """Smallest divisor TR of h_out whose flattened block L = TR*W_out is
    lane-dense (multiple of 128) and reasonably sized; fall back to the full
    image (block == full dims is always legal)."""
    for target in (512, 128):
        for tr in range(1, h_out + 1):
            if h_out % tr:
                continue
            l = tr * w_out
            if l % 128 == 0 and l >= target:
                return tr
    return h_out


def _make_kernel(*, kh_sz, kw_sz, stride, dilation, pad_h, pad_w,
                 h_in, w_in, h_out, w_out, tr, c_in, c_out, eps):
    l_blk = tr * w_out
    # rows of the padded image needed by one row block (incl. tap halo)
    span_h = stride * (tr - 1) + 1
    span_w = stride * (w_out - 1) + 1
    band_h = span_h + dilation * (kh_sz - 1)

    def kernel(x_ref, w_ref, gamma_ref, beta_ref, o_ref, xpad_ref):
        r = pl.program_id(1)

        # Zero-padded image lives in a VMEM scratch, filled once per image
        # (first row block).  Replaces the wrapper-side jnp.pad HBM pass.
        @pl.when(r == 0)
        def _():
            xpad_ref[...] = jnp.zeros(xpad_ref.shape, xpad_ref.dtype)
            xpad_ref[:, pad_h:pad_h + h_in, pad_w:pad_w + w_in] = (
                x_ref[0].astype(xpad_ref.dtype))

        # One dynamic-sublane slice per block: the row band for this block.
        r0 = pl.multiple_of(r * (tr * stride), tr * stride)
        band = xpad_ref[:, pl.ds(r0, band_h), :]          # (Cin, band_h, Wp)

        # im2col: build ONE (K, L) operand, K = KH*KW*Cin, L = TR*W_out on the
        # lane axis.  Tap offsets are static -> static (possibly strided)
        # slices of the register-resident band.
        slabs = []
        for kh in range(kh_sz):
            for kw in range(kw_sz):
                h0 = kh * dilation
                w0 = kw * dilation
                blk = lax.slice(
                    band,
                    (0, h0, w0),
                    (c_in, h0 + span_h, w0 + span_w),
                    (1, stride, stride),
                )                                         # (Cin, TR, W_out)
                slabs.append(blk.reshape(c_in, l_blk))
        patches = jnp.concatenate(slabs, axis=0)          # (K, L)

        # Single fused MXU matmul, f32 accumulation.
        acc = jnp.dot(w_ref[...], patches,
                      preferred_element_type=jnp.float32)  # (Cout, L)

        # LayerNorm over channels (sublane axis); spatial stays lane-dense.
        mean = jnp.mean(acc, axis=0, keepdims=True)
        xc = acc - mean
        var = jnp.mean(xc * xc, axis=0, keepdims=True)
        inv = lax.rsqrt(var + eps)
        y = xc * inv * gamma_ref[...] + beta_ref[...]

        o_ref[0] = y.astype(o_ref.dtype)

    return kernel


def conv_ln_forward(x_nchw, weight, gamma, beta, *, stride, pad, dilation,
                    eps=1e-5, compute_dtype=jnp.float32,
                    out_dtype=jnp.float32):
    """x_nchw: (N, Cin, H, W); weight: (Cout, Cin, KH, KW) (PyTorch layout)."""
    n, c_in, h, w = x_nchw.shape
    c_out, c_in_w, kh_sz, kw_sz = weight.shape
    assert c_in == c_in_w

    # PyTorch module: padding = dilation if dilation > 1 else pad
    padding = dilation if dilation > 1 else pad
    h_out = (h + 2 * padding - dilation * (kh_sz - 1) - 1) // stride + 1
    w_out = (w + 2 * padding - dilation * (kw_sz - 1) - 1) // stride + 1
    hp, wp = h + 2 * padding, w + 2 * padding
    # Guarantee the in-kernel tap slices stay inside the padded scratch
    # (Pallas does no runtime bounds check on VMEM refs).
    assert dilation * (kh_sz - 1) + stride * (h_out - 1) + 1 <= hp
    assert dilation * (kw_sz - 1) + stride * (w_out - 1) + 1 <= wp

    tr = _pick_row_block(h_out, w_out)
    l_blk = tr * w_out
    k_dim = kh_sz * kw_sz * c_in

    # Matmul operands in compute_dtype (bf16 on v6e/v7x halves DMA bytes and
    # feeds the bf16 MXU at full rate); LayerNorm / accumulation stay f32.
    x_in = x_nchw.astype(compute_dtype)
    # (Cout, Cin, KH, KW) -> (Cout, KH*KW*Cin); K order (kh, kw, cin) matches
    # the in-kernel im2col stacking order.
    w_mat = (jnp.transpose(weight, (0, 2, 3, 1))
             .reshape(c_out, k_dim).astype(compute_dtype))
    gamma2 = gamma.reshape(c_out, 1).astype(jnp.float32)
    beta2 = beta.reshape(c_out, 1).astype(jnp.float32)

    kernel = _make_kernel(
        kh_sz=kh_sz, kw_sz=kw_sz, stride=stride, dilation=dilation,
        pad_h=padding, pad_w=padding, h_in=h, w_in=w,
        h_out=h_out, w_out=w_out, tr=tr, c_in=c_in, c_out=c_out, eps=eps)

    out_flat = pl.pallas_call(
        kernel,
        out_shape=jax.ShapeDtypeStruct((n, c_out, h_out * w_out), out_dtype),
        grid_spec=pltpu.PrefetchScalarGridSpec(
            num_scalar_prefetch=0,
            grid=(n, h_out // tr),
            in_specs=[
                # Image block index depends only on the batch coordinate, so
                # the DMA happens once per image and the block stays resident
                # across the row-block axis.
                pl.BlockSpec((1, c_in, h, w), lambda i, r: (i, 0, 0, 0)),
                # Weights / LN params: resident for the whole grid.
                pl.BlockSpec((c_out, k_dim), lambda i, r: (0, 0)),
                pl.BlockSpec((c_out, 1), lambda i, r: (0, 0)),
                pl.BlockSpec((c_out, 1), lambda i, r: (0, 0)),
            ],
            # Lane-dense NCHW-flat output: last dim TR*W_out (multiple of 128).
            out_specs=pl.BlockSpec((1, c_out, l_blk), lambda i, r: (i, 0, r)),
            scratch_shapes=[pltpu.VMEM((c_in, hp, wp), compute_dtype)],
        ),
        compiler_params=pltpu.CompilerParams(
            dimension_semantics=("parallel", "arbitrary")),
    )(x_in, w_mat, gamma2, beta2)

    # Trailing-dim split only — the kernel already produced NCHW order.
    return out_flat.reshape(n, c_out, h_out, w_out)


def _reference(x_nchw, weight, gamma, beta, *, stride, pad, dilation, eps=1e-5):
    padding = dilation if dilation > 1 else pad
    y = lax.conv_general_dilated(
        x_nchw.astype(jnp.float32), weight.astype(jnp.float32),
        window_strides=(stride, stride),
        padding=((padding, padding), (padding, padding)),
        rhs_dilation=(dilation, dilation),
        dimension_numbers=("NCHW", "OIHW", "NCHW"),
    )
    y = jnp.transpose(y, (0, 2, 3, 1))  # NHWC for the channel LayerNorm
    mean = jnp.mean(y, axis=-1, keepdims=True)
    var = jnp.mean((y - mean) ** 2, axis=-1, keepdims=True)
    y = (y - mean) * lax.rsqrt(var + eps) * gamma + beta
    return jnp.transpose(y, (0, 3, 1, 2))


if __name__ == "__main__":
    # ConvLn(in_planes=4, out_planes=32, kernel_size=3, stride=1, pad=1, dil)
    in_planes, out_planes = 4, 32
    kernel_size, stride, pad = 3, 1, 1
    N, H, W = 2, 16, 16

    key = jax.random.PRNGKey(0)
    kx, kw = jax.random.split(key)
    x = jax.random.normal(kx, (N, in_planes, H, W), dtype=jnp.float32)
    fan_in = in_planes * kernel_size * kernel_size
    weight = jax.random.normal(
        kw, (out_planes, in_planes, kernel_size, kernel_size),
        dtype=jnp.float32) * (1.0 / jnp.sqrt(fan_in))
    gamma = jnp.ones((out_planes,), jnp.float32)   # LayerNorm default affine
    beta = jnp.zeros((out_planes,), jnp.float32)

    # dilation=1 and dilation=2 (used by PyramidLayer.layer4) in f32, plus the
    # bf16-operand path (v6e/v7x bandwidth mode) with a looser tolerance.
    cases = ((1, jnp.float32, 1e-3),
             (2, jnp.float32, 1e-3),
             (1, jnp.bfloat16, 1e-1))
    for dilation, cdt, atol in cases:
        out = conv_ln_forward(x, weight, gamma, beta,
                              stride=stride, pad=pad, dilation=dilation,
                              compute_dtype=cdt)
        out = jax.block_until_ready(out)
        ref = _reference(x, weight, gamma, beta,
                         stride=stride, pad=pad, dilation=dilation)
        assert out.shape == ref.shape == (N, out_planes, H, W), out.shape
        err = float(jnp.max(jnp.abs(out - ref)))
        assert err < atol, (dilation, str(cdt), err)

    print("KERNEL_OK")
</pallas_src>

<mosaic_0001>
module attributes {stable_mosaic.version = 11 : i64} {
  func.func @kernel(%arg0: i32, %arg1: i32, %arg2: memref<1x4x16x16xf32, #tpu.memory_space<vmem>>, %arg3: memref<32x36xf32, #tpu.memory_space<vmem>>, %arg4: memref<32x1xf32, #tpu.memory_space<vmem>>, %arg5: memref<32x1xf32, #tpu.memory_space<vmem>>, %arg6: memref<1x32x128xf32, #tpu.memory_space<vmem>>, %arg7: memref<4x18x18xf32, #tpu.memory_space<vmem>>) attributes {dimension_semantics = [#tpu.dimension_semantics<parallel>, #tpu.dimension_semantics<arbitrary>], iteration_bounds = array<i64: 2, 2>, scalar_prefetch = 0 : i64, scratch_operands = 1 : i64, tpu.core_type = #tpu.core_type<tc>, window_params = [{transform_indices = @transform_0, window_bounds = array<i64: 1, 4, 16, 16>}, {pipeline_mode = #tpu.pipeline_mode<synchronous>, transform_indices = @transform_1, window_bounds = array<i64: 32, 36>}, {pipeline_mode = #tpu.pipeline_mode<synchronous>, transform_indices = @transform_2, window_bounds = array<i64: 32, 1>}, {pipeline_mode = #tpu.pipeline_mode<synchronous>, transform_indices = @transform_3, window_bounds = array<i64: 32, 1>}, {transform_indices = @transform_4, window_bounds = array<i64: 1, 32, 128>}]} {
    %c0_i32 = arith.constant 0 : i32
    %0 = arith.cmpi eq, %arg1, %c0_i32 : i32
    %1 = arith.extui %0 : i1 to i32
    %c0_i32_0 = arith.constant 0 : i32
    %2 = arith.cmpi ne, %1, %c0_i32_0 : i32
    scf.if %2 {
      %cst_16 = arith.constant 0.000000e+00 : f32
      %53 = vector.broadcast %cst_16 : f32 to vector<4x18x18xf32>
      %c0_17 = arith.constant 0 : index
      %c0_18 = arith.constant 0 : index
      %c0_19 = arith.constant 0 : index
      %54 = vector.load %arg7[%c0_17, %c0_18, %c0_19] : memref<4x18x18xf32, #tpu.memory_space<vmem>>, vector<4x18x18xf32>
      tpu.vector_store %arg7[%c0_17, %c0_18, %c0_19], %53 {strides = array<i32>} : memref<4x18x18xf32, #tpu.memory_space<vmem>>, vector<4x18x18xf32>,
      %c0_20 = arith.constant 0 : index
      %c0_21 = arith.constant 0 : index
      %c0_22 = arith.constant 0 : index
      %c0_23 = arith.constant 0 : index
      %55 = vector.load %arg2[%c0_20, %c0_21, %c0_22, %c0_23] : memref<1x4x16x16xf32, #tpu.memory_space<vmem>>, vector<1x4x16x16xf32>
      %56 = vector.shape_cast %55 : vector<1x4x16x16xf32> to vector<4x16x16xf32>
      %c0_24 = arith.constant 0 : index
      %c1 = arith.constant 1 : index
      %c1_25 = arith.constant 1 : index
      %57 = vector.load %arg7[%c0_24, %c1, %c1_25] : memref<4x18x18xf32, #tpu.memory_space<vmem>>, vector<4x16x16xf32>
      tpu.vector_store %arg7[%c0_24, %c1, %c1_25], %56 {strides = array<i32>} : memref<4x18x18xf32, #tpu.memory_space<vmem>>, vector<4x16x16xf32>,
    } else {
    }
    %c8_i32 = arith.constant 8 : i32
    %3 = arith.muli %arg1, %c8_i32 : i32
    %4 = tpu.assume_multiple %3, 8 : i32
    %c0 = arith.constant 0 : index
    %5 = arith.index_cast %4 : i32 to index
    %c0_1 = arith.constant 0 : index
    %6 = vector.load %arg7[%c0, %5, %c0_1] : memref<4x18x18xf32, #tpu.memory_space<vmem>>, vector<4x10x18xf32>
    %7 = vector.extract_strided_slice %6 {offsets = [0, 0, 0], sizes = [4, 8, 16], strides = [1, 1, 1]} : vector<4x10x18xf32> to vector<4x8x16xf32>
    %8 = vector.shape_cast %7 : vector<4x8x16xf32> to vector<4x128xf32>
    %9 = vector.extract_strided_slice %6 {offsets = [0, 0, 1], sizes = [4, 8, 16], strides = [1, 1, 1]} : vector<4x10x18xf32> to vector<4x8x16xf32>
    %10 = vector.shape_cast %9 : vector<4x8x16xf32> to vector<4x128xf32>
    %11 = vector.extract_strided_slice %6 {offsets = [0, 0, 2], sizes = [4, 8, 16], strides = [1, 1, 1]} : vector<4x10x18xf32> to vector<4x8x16xf32>
    %12 = vector.shape_cast %11 : vector<4x8x16xf32> to vector<4x128xf32>
    %13 = vector.extract_strided_slice %6 {offsets = [0, 1, 0], sizes = [4, 8, 16], strides = [1, 1, 1]} : vector<4x10x18xf32> to vector<4x8x16xf32>
    %14 = vector.shape_cast %13 : vector<4x8x16xf32> to vector<4x128xf32>
    %15 = vector.extract_strided_slice %6 {offsets = [0, 1, 1], sizes = [4, 8, 16], strides = [1, 1, 1]} : vector<4x10x18xf32> to vector<4x8x16xf32>
    %16 = vector.shape_cast %15 : vector<4x8x16xf32> to vector<4x128xf32>
    %17 = vector.extract_strided_slice %6 {offsets = [0, 1, 2], sizes = [4, 8, 16], strides = [1, 1, 1]} : vector<4x10x18xf32> to vector<4x8x16xf32>
    %18 = vector.shape_cast %17 : vector<4x8x16xf32> to vector<4x128xf32>
    %19 = vector.extract_strided_slice %6 {offsets = [0, 2, 0], sizes = [4, 8, 16], strides = [1, 1, 1]} : vector<4x10x18xf32> to vector<4x8x16xf32>
    %20 = vector.shape_cast %19 : vector<4x8x16xf32> to vector<4x128xf32>
    %21 = vector.extract_strided_slice %6 {offsets = [0, 2, 1], sizes = [4, 8, 16], strides = [1, 1, 1]} : vector<4x10x18xf32> to vector<4x8x16xf32>
    %22 = vector.shape_cast %21 : vector<4x8x16xf32> to vector<4x128xf32>
    %23 = vector.extract_strided_slice %6 {offsets = [0, 2, 2], sizes = [4, 8, 16], strides = [1, 1, 1]} : vector<4x10x18xf32> to vector<4x8x16xf32>
    %24 = vector.shape_cast %23 : vector<4x8x16xf32> to vector<4x128xf32>
    %25 = tpu.concatenate %8, %10, %12, %14, %16, %18, %20, %22, %24 in 0 : vector<4x128xf32>, vector<4x128xf32>, vector<4x128xf32>, vector<4x128xf32>, vector<4x128xf32>, vector<4x128xf32>, vector<4x128xf32>, vector<4x128xf32>, vector<4x128xf32> -> vector<36x128xf32>
    %c0_2 = arith.constant 0 : index
    %c0_3 = arith.constant 0 : index
    %26 = vector.load %arg3[%c0_2, %c0_3] : memref<32x36xf32, #tpu.memory_space<vmem>>, vector<32x36xf32>
    %cst = arith.constant dense<0.000000e+00> : vector<32x128xf32>
    %27 = tpu.matmul %26, %25, %cst {dimension_numbers = #tpu.dot_dimension_numbers<[1], [0], [0], [1], [0, 0, 1, 1], [], []>} : vector<32x36xf32>, vector<36x128xf32>, vector<32x128xf32> -> vector<32x128xf32>
    %cst_4 = arith.constant dense<0.000000e+00> : vector<128xf32>
    %28 = vector.multi_reduction <add>, %27, %cst_4 [0] : vector<32x128xf32> to vector<128xf32>
    %29 = vector.shape_cast %28 : vector<128xf32> to vector<1x128xf32>
    %cst_5 = arith.constant 3.200000e+01 : f32
    %30 = vector.broadcast %cst_5 : f32 to vector<1x128xf32>
    %31 = arith.divf %29, %30 : vector<1x128xf32>
    %32 = vector.broadcast %31 : vector<1x128xf32> to vector<32x128xf32>
    %33 = arith.subf %27, %32 : vector<32x128xf32>
    %34 = arith.mulf %33, %33 : vector<32x128xf32>
    %cst_6 = arith.constant dense<0.000000e+00> : vector<128xf32>
    %35 = vector.multi_reduction <add>, %34, %cst_6 [0] : vector<32x128xf32> to vector<128xf32>
    %36 = vector.shape_cast %35 : vector<128xf32> to vector<1x128xf32>
    %cst_7 = arith.constant 3.200000e+01 : f32
    %37 = vector.broadcast %cst_7 : f32 to vector<1x128xf32>
    %38 = arith.divf %36, %37 : vector<1x128xf32>
    %cst_8 = arith.constant 9.99999974E-6 : f32
    %39 = vector.broadcast %cst_8 : f32 to vector<1x128xf32>
    %40 = arith.addf %38, %39 : vector<1x128xf32>
    %41 = math.rsqrt %40 : vector<1x128xf32>
    %42 = vector.broadcast %41 : vector<1x128xf32> to vector<32x128xf32>
    %43 = arith.mulf %33, %42 : vector<32x128xf32>
    %c0_9 = arith.constant 0 : index
    %c0_10 = arith.constant 0 : index
    %44 = vector.load %arg4[%c0_9, %c0_10] : memref<32x1xf32, #tpu.memory_space<vmem>>, vector<32x1xf32>
    %45 = vector.broadcast %44 : vector<32x1xf32> to vector<32x128xf32>
    %46 = arith.mulf %43, %45 : vector<32x128xf32>
    %c0_11 = arith.constant 0 : index
    %c0_12 = arith.constant 0 : index
    %47 = vector.load %arg5[%c0_11, %c0_12] : memref<32x1xf32, #tpu.memory_space<vmem>>, vector<32x1xf32>
    %48 = vector.broadcast %47 : vector<32x1xf32> to vector<32x128xf32>
    %49 = arith.addf %46, %48 : vector<32x128xf32>
    %c0_13 = arith.constant 0 : index
    %c0_14 = arith.constant 0 : index
    %c0_15 = arith.constant 0 : index
    %50 = vector.load %arg6[%c0_13, %c0_14, %c0_15] : memref<1x32x128xf32, #tpu.memory_space<vmem>>, vector<1x32x128xf32>
    %51 = vector.shape_cast %50 : vector<1x32x128xf32> to vector<32x128xf32>
    %52 = vector.shape_cast %49 : vector<32x128xf32> to vector<1x32x128xf32>
    tpu.vector_store %arg6[%c0_13, %c0_14, %c0_15], %52 {strides = array<i32>} : memref<1x32x128xf32, #tpu.memory_space<vmem>>, vector<1x32x128xf32>,
    return
  }
  func.func @transform_0(%arg0: i32, %arg1: i32) -> (i32, i32, i32, i32) {
    %c0_i32 = arith.constant 0 : i32
    %c0_i32_0 = arith.constant 0 : i32
    %c0_i32_1 = arith.constant 0 : i32
    %c0_i32_2 = arith.constant 0 : i32
    return %arg0, %c0_i32, %c0_i32_0, %c0_i32_1 : i32, i32, i32, i32
  }
  func.func @transform_1(%arg0: i32, %arg1: i32) -> (i32, i32) {
    %c0_i32 = arith.constant 0 : i32
    %c0_i32_0 = arith.constant 0 : i32
    %c0_i32_1 = arith.constant 0 : i32
    return %c0_i32, %c0_i32_0 : i32, i32
  }
  func.func @transform_2(%arg0: i32, %arg1: i32) -> (i32, i32) {
    %c0_i32 = arith.constant 0 : i32
    %c0_i32_0 = arith.constant 0 : i32
    %c0_i32_1 = arith.constant 0 : i32
    return %c0_i32, %c0_i32_0 : i32, i32
  }
  func.func @transform_3(%arg0: i32, %arg1: i32) -> (i32, i32) {
    %c0_i32 = arith.constant 0 : i32
    %c0_i32_0 = arith.constant 0 : i32
    %c0_i32_1 = arith.constant 0 : i32
    return %c0_i32, %c0_i32_0 : i32, i32
  }
  func.func @transform_4(%arg0: i32, %arg1: i32) -> (i32, i32, i32) {
    %c0_i32 = arith.constant 0 : i32
    %c0_i32_0 = arith.constant 0 : i32
    return %arg0, %c0_i32, %arg1 : i32, i32, i32
  }
}

</mosaic_0001>

<bundles_post_ra>
// kernel: tpu_custom_call.1
= control target key start
LH: loop header
LB: loop body
LE: loop exit
PB: predicated region body
PF: predicated region fallthrough
CT: control target
= control target key end

     0   :  { %9 = vsyncpa [#allocation4], 0  ;;  %s3017_s0 = inlined_call_operand.hbm [shape: f32[2,4,16,16], index: 0, kind: input, shape index: {}]   ;;  %s3018_s1 = inlined_call_operand.vmem [shape: f32[32,36], index: 1, kind: input, shape index: {}]   ;;  %s3019_s2 = inlined_call_operand.vmem [shape: f32[32,1], index: 2, kind: input, shape index: {}]   ;;  %s3020_s3 = inlined_call_operand.vmem [shape: f32[32,1], index: 3, kind: input, shape index: {}]   ;;  %s3021_s4 = inlined_call_operand.hbm [shape: f32[2,32,256], index: 4, kind: output, shape index: {}]  }
   0x1   :  { %11 = vsyncpa [#allocation4 + $0x1], 0 }
   0x2   :  { %12 = vsyncpa [#allocation5], 0 }
   0x3   :  { %14 = vsyncpa [#allocation5 + $0x1], 0  ;;  %s2208_s15 = smov 0   ;;  %s2210_s16 = smov 0  }
   0x4   :  { %s2212_s17 = smov 0   ;;  %s2214_s18 = smov 0  }
   0x5   :  { %s2216_s19 = smov 0   ;;  %s2218_s20 = smov 0  }
   0x6   :  { %s2220_s21 = smov 0   ;;  %s2222_s22 = smov 0  }
   0x7   :  { %s2224_s23 = smov 0   ;;  %s2226_s24 = smov 0  }
   0x8   :  { %s2228_s25 = smov 0  }
   0x9 LB: > { %s1675_s26 = sadd.s32 4294967295, %s2159_s25   ;;  %s1676_s27 = sadd.s32 4294967294, %s2159_s25   ;;  %s2159_s25 = sphi %s2228_s25, %s20_s25   ;;  %s2155_s24 = sphi %s2226_s24, %s3048_s24   ;;  %s2151_s23 = sphi %s2224_s23, %s3047_s23   ;;  %s2147_s22 = sphi %s2222_s22, %s3046_s22   ;;  %s2143_s21 = sphi %s2220_s21, %s3045_s21   ;;  %s2139_s20 = sphi %s2218_s20, %s3044_s20   ;;  %s2135_s19 = sphi %s2216_s19, %s3043_s19   ;;  %s2131_s18 = sphi %s2214_s18, %s3042_s18   ;;  %s2127_s17 = sphi %s2212_s17, %s3041_s17   ;;  %s2123_s16 = sphi %s2210_s16, %s3040_s16   ;;  %s2119_s15 = sphi %s2208_s15, %s3039_s15  }
   0xa   : > { %s29_s28 = sadd.s32 1, %s2151_s23  ;;  %s32_s29 = sadd.s32 1, %s2155_s24 }
   0xb   : > { %p30_p0 = scmp.ge.s32.totalorder %s29_s28, 2  ;;  %s39_s30 = sadd.s32 1, %s2139_s20 }
   0xc   : > { %p46_p1 = scmp.ne.s32.totalorder %s2139_s20, %s2135_s19  ;;  %p47_p2 = scmp.eq.s32.totalorder %s2159_s25, 0 }
   0xd   : > { %s3050_s28 = smov (%p30_p0, %s29_s28), 0  ;;  %s3052_s29 = smov (!%p30_p0, %s32_s29), %s2155_s24 }
   0xe   : > { %3026 = sst [smem:[#allocation9_spill]] %s3050_s28  ;;  %p2272_p3 = por %p47_p2, %p46_p1 }
   0xf   : > { %p52_p4 = scmp.ne.s32.totalorder %s2135_s19, %s2131_s18  ;;  %p34_p5 = scmp.ge.s32.totalorder %s3052_s29, 2 }
  0x10   : > { %p53_p6 = scmp.eq.s32.totalorder %s1675_s26, 0  ;;  %s126_s6 = ssub.s32 %s2151_s23, %s3050_s28 }
  0x11   : > { %s130_s7 = sadd.s32 1, %s2127_s17  ;;  %s3054_s29 = smov (%p34_p5, %s3052_s29), 0 }
  0x12   : > { %3028 = sst [smem:[#allocation10_spill]] %s3054_s29  ;;  %p2282_p7 = por %p53_p6, %p52_p4 }
  0x13   : > { %p140_p8 = scmp.ne.s32.totalorder %s2127_s17, %s2123_s16  ;;  %s36_s9 = ssub.s32 %s2155_s24, %s3054_s29 }
  0x14   : > { %p141_p9 = scmp.eq.s32.totalorder %s1675_s26, 3  ;;  %p37_p10 = scmp.eq.s32.totalorder %s36_s9, 0 }
  0x15   : > { %s127_s10 = sor.u32 %s126_s6, %s36_s9  ;;  %p146_p13 = scmp.ne.s32.totalorder %s2123_s16, %s2119_s15 }
  0x16   : > { %p128_p11 = scmp.eq.s32.totalorder %s127_s10, 0  ;;  %p2290_p12 = por %p141_p9, %p140_p8 }
  0x17   : > { %s2295_s12 = scalar_select %p37_p10, %s2139_s20, %s39_s30  }
  0x18   : > { %s3030_s11 = scalar_select %p2290_p12, 1, 0 }
  0x19   : > { %s2298_s13 = scalar_select %p128_p11, %s2127_s17, %s130_s7  }
  0x1a   : > { %p147_p0 = scmp.eq.s32.totalorder %s1676_s27, 3  ;;  %p1749_p1 = scmp.lt.s32.totalorder %s2159_s25, 4 }
  0x1b   : > { %s176_s18 = sand.u32 1, %s2139_s20   ;;  %s1697_s6 = sshll.u32 %s2155_s24, 10 }
  0x1c   : > { %p2303_p2 = por %p147_p0, %p146_p13  ;;  %s1679_s26 = sshll.u32 %s176_s18, 6 }
  0x1d   : > { %s2312_s29 = scalar_lea.hbm %s3017_s0, %s1697_s6  ;;  %s180_s30 = scalar_lea.vmem [#allocation3], %s1679_s26 }
  0x1e   : > { %s3031_s14 = scalar_select %p2303_p2, 1, 0 }
  0x1f   : > { %s187_s7 = sshll.u32 %s180_s30, 4  ;;  %p2318_p4 = pnand %p1749_p1, %p2272_p3  ;;  %s2314_s7 = int_to_ptr.vmem [resolvable:$true] %s187_s7 }
  0x20   : > { %s2323_s28 = scalar_lea.sflag [#allocation4], %s176_s18  ;;  %s2007_s6 = scalar_lea.hbm %s2312_s29, 1024 }
  0x21   : > { %p2008_p6 = scmp.ne.s32.totalorder %s2312_s29, %s2007_s6  ;;  %p2009_p8 = pneg %p2318_p4 }
  0x22   : > { %s2012_s5 = scalar_lea.hbm %s3017_s0, 2048  ;;  %p2013_p3 = scmp.lt.u32.totalorder %s2312_s29, %s3017_s0 }
  0x23   : > { %p2010_p9 = pnand %p2009_p8, %p2008_p6  ;;  %p2014_p11 = scmp.lt.u32.totalorder %s2012_s5, %s2007_s6 }
  0x24   : > { %p2016_p0 = scmp.lt.u32.totalorder %s2007_s6, %s2312_s29 }
  0x25   : > { %p2011_p10 = pneg %p2010_p9  ;;  %p2015_p13 = por %p2014_p11, %p2013_p3 }
  0x27   : > { %p2017_p1 = por %p2016_p0, %p2015_p13 }
  0x29   : > { %p2018_p5 = pnand %p2017_p1, %p2011_p10 }
  0x2b   : > { %2021 = shalt.err (!%p2018_p5)
}
  0x2c   : > { %s2022_s18 = scalar_lea.vmem %s2314_s7, 1024  ;;  %s2161_s26 = smov [#allocation3]  }
  0x2d   : > { %p2023_p6 = scmp.ne.s32.totalorder %s2314_s7, %s2022_s18  ;;  %s2027_s9 = sshll.u32 %s2161_s26, 4  ;;  %s2028_s9 = int_to_ptr.vmem [resolvable:$false] %s2027_s9 }
  0x2e   : > { %s2029_s10 = scalar_lea.vmem %s2028_s9, 2048  ;;  %p2030_p12 = scmp.lt.s32.totalorder %s2314_s7, %s2028_s9 }
  0x2f   : > { %p2025_p9 = pnand %p2023_p6, %p2009_p8  ;;  %p2031_p3 = scmp.lt.s32.totalorder %s2029_s10, %s2022_s18 }
  0x31   : > { %p2026_p2 = pneg %p2025_p9  ;;  %p2032_p11 = por %p2031_p3, %p2030_p12 }
  0x33   : > { %p2033_p13 = pnand %p2032_p11, %p2026_p2 }
  0x35   : > { %2036 = shalt.err (!%p2033_p13)
}
  0x36   : > { %s2162_s6 = smov 128   ;;  %s2163_s5 = smov 8  }
  0x37   : > { %1744 = dma.hbm_to_vmem [thread:$0]  (!%p2318_p4), %s2312_s29, 1024, %s2314_s7, %s2323_s28, %s2162_s6, %s2162_s6, %s2163_s5  }
  0x38   : > { %p195_p5 = scmp.lt.s32.totalorder %s2159_s25, 5  ;;  %p3033_p8 = scmp.ge.s32.totalorder %s2159_s25, 1 }
  0x3a   : > { %p196_p10 = pnand %p3033_p8, %p195_p5 }
  0x3b   : > { %s201_s30 = sand.u32 (!%p196_p10), 1, %s2135_s19  }
  0x3c   : > { %199 = sbr.rel (%p196_p10) target bundleno = 821 (0x335), region = 36  ;;  %s1683_s18 = sshll.u32 (!%p196_p10), %s201_s30, 6 }
  0x3d   : > { %s202_s26 = scalar_lea.sflag (!%p196_p10), [#allocation4], %s201_s30  ;;  %s2355_s9 = scalar_lea.vmem (!%p196_p10), [#allocation3], %s1683_s18 }
  0x43   : > { %2110 = dma.done.wait (%p2282_p7), %s202_s26, 1024  }
  0x44   : > { %2112 = vsyncadd (%p2282_p7), %s202_s26, 4294966272  ;;  %s3025_s27 = sand.u32 1, %s2123_s16   ;;  %p1685_p12 = scmp.ne.s32.totalorder %s2143_s21, 0 }
  0x45   : > { %s1684_s28 = sshll.u32 %s3025_s27, 5  ;;  %v250_v0 = vld [vmem:[%s2355_s9 + $0x10] sm:$0xff] (!%p1685_p12)  ;;  %v248_v1 = vld [vmem:[%s2355_s9] sm:$0xff] (!%p1685_p12)  ;;  %vm234_vm0 = vcmask (!%p1685_p12), 146432   ;;  %s2164_s7 = smov (!%p1685_p12), 1   ;;  %vm237_vm1 = vcmask (!%p1685_p12), 140288  }
  0x46   : > { %s2364_s29 = scalar_lea.vmem [#allocation6], %s1684_s28  ;;  %233 = sbr.rel (%p1685_p12) target bundleno = 198 (0xc6), region = 44  ;;  %268 = vrot.lane.b32.xlu1 (!%p1685_p12), %v250_v0, %s2164_s7  ;;  %264 = vrot.lane.b32.xlu0 (!%p1685_p12), %v248_v1, %s2164_s7  ;;  %v251_v2 = vld [vmem:[%s2355_s9 + $0x18] sm:$0xff] (!%p1685_p12)  ;;  %v249_v3 = vld [vmem:[%s2355_s9 + $0x8] sm:$0xff] (!%p1685_p12)  ;;  %v2165_v4 = vmov (!%p1685_p12), 0.0   ;;  %vm288_vm2 = vcmask (!%p1685_p12), 138248  }
  0x47   : > { %239 = vst.msk [vmem:[#allocation2 + $0x18] sm:$0xff] (!%p1685_p12), %vm234_vm0, %v2165_v4  ;;  %240 = vst.msk [vmem:[#allocation2 + $0x20] sm:$0xff] (!%p1685_p12), %vm234_vm0, %v2165_v4  ;;  %v253_v5 = vld [vmem:[%s2355_s9 + $0x28] sm:$0xff] (!%p1685_p12)  ;;  %v252_v6 = vld [vmem:[%s2355_s9 + $0x20] sm:$0xff] (!%p1685_p12) }
  0x48   : > { %235 = vst.msk [vmem:[#allocation2] sm:$0xff] (!%p1685_p12), %vm234_vm0, %v2165_v4  ;;  %236 = vst.msk [vmem:[#allocation2 + $0x8] sm:$0xff] (!%p1685_p12), %vm234_vm0, %v2165_v4  ;;  %v255_v7 = vld [vmem:[%s2355_s9 + $0x38] sm:$0xff] (!%p1685_p12)  ;;  %v254_v8 = vld [vmem:[%s2355_s9 + $0x30] sm:$0xff] (!%p1685_p12) }
  0x49   : > { %242 = vst.msk [vmem:[#allocation2 + $0x30] sm:$0xff] (!%p1685_p12), %vm234_vm0, %v2165_v4  ;;  %243 = vst.msk [vmem:[#allocation2 + $0x38] sm:$0xff] (!%p1685_p12), %vm234_vm0, %v2165_v4 }
  0x4a   : > { %245 = vst.msk [vmem:[#allocation2 + $0x48] sm:$0xff] (!%p1685_p12), %vm234_vm0, %v2165_v4  ;;  %246 = vst.msk [vmem:[#allocation2 + $0x50] sm:$0xff] (!%p1685_p12), %vm234_vm0, %v2165_v4  ;;  %270 = vrot.lane.b32.xlu1 (!%p1685_p12), %v251_v2, %s2164_s7  ;;  %266 = vrot.lane.b32.xlu0 (!%p1685_p12), %v249_v3, %s2164_s7 }
  0x4b   : > { %241 = vst.msk [vmem:[#allocation2 + $0x28] sm:$0x3] (!%p1685_p12), %vm237_vm1, %v2165_v4  ;;  %238 = vst.msk [vmem:[#allocation2 + $0x10] sm:$0x3] (!%p1685_p12), %vm237_vm1, %v2165_v4 }
  0x4c   : > { %244 = vst.msk [vmem:[#allocation2 + $0x40] sm:$0x3] (!%p1685_p12), %vm237_vm1, %v2165_v4  ;;  %247 = vst.msk [vmem:[#allocation2 + $0x58] sm:$0x3] (!%p1685_p12), %vm237_vm1, %v2165_v4 }
  0x4e   : > { %274 = vrot.lane.b32.xlu1 %v253_v5, %s2164_s7  ;;  %272 = vrot.lane.b32.xlu0 %v252_v6, %s2164_s7 }
  0x52   : > { %278 = vrot.lane.b32.xlu1 %v255_v7, %s2164_s7  ;;  %276 = vrot.lane.b32.xlu0 %v254_v8, %s2164_s7 }
  0xb8   : > { %v269_v9 = vpop.permute.xlu1 %268  ;;  %v265_v10 = vpop.permute.xlu0 %264 }
  0xb9   : > { %291 = vst.msk [vmem:[#allocation2 + $0x19] sm:$0xff] %vm288_vm2, %v269_v9  ;;  %289 = vst.msk [vmem:[#allocation2 + $0x1] sm:$0xff] %vm288_vm2, %v265_v10 }
  0xbc   : > { %v271_v11 = vpop.permute.xlu1 %270  ;;  %v267_v12 = vpop.permute.xlu0 %266 }
  0xbd   : > { %292 = vst.msk [vmem:[#allocation2 + $0x21] sm:$0xff] %vm288_vm2, %v271_v11  ;;  %290 = vst.msk [vmem:[#allocation2 + $0x9] sm:$0xff] %vm288_vm2, %v267_v12 }
  0xc0   : > { %v275_v13 = vpop.permute.xlu1 %274  ;;  %v273_v14 = vpop.permute.xlu0 %272 }
  0xc1   : > { %294 = vst.msk [vmem:[#allocation2 + $0x39] sm:$0xff] %vm288_vm2, %v275_v13  ;;  %293 = vst.msk [vmem:[#allocation2 + $0x31] sm:$0xff] %vm288_vm2, %v273_v14 }
  0xc4   : > { %v279_v15 = vpop.permute.xlu1 %278  ;;  %v277_v16 = vpop.permute.xlu0 %276 }
  0xc5   : > { %296 = vst.msk [vmem:[#allocation2 + $0x51] sm:$0xff] %vm288_vm2, %v279_v15  ;;  %295 = vst.msk [vmem:[#allocation2 + $0x49] sm:$0xff] %vm288_vm2, %v277_v16 }
  0xc6 PF: > { %s1686_s8 = sshll.u32 %s2143_s21, 3  ;;  %v312_v17 = vlaneseq  ;;  %v2166_v18 = vmov 1983009808   ;;  %vm655_vm3 = vcmask 1046528   ;;  %s2167_s6 = smov 127   ;;  %vm1005_vm4 = vcmask 1045504  }
  0xc7   : > { %v310_v19 = vunpack.c.l.s4 %v2166_v18  ;;  %s298_s10 = scalar_lea.vmem [#allocation2], %s1686_s8  ;;  %s2168_s5 = smov 126   ;;  %vm1376_vm5 = vcmask 293888   ;;  %vm403_vm6 = vcmask 130048   ;;  %vm405_vm7 = vcmask 261120  }
  0xc8   : > { %v2390_v23 = vshrl.u32 %v312_v17, 7  ;;  %s2170_s30 = smov 32   ;;  %s2171_s18 = smov 64   ;;  %vm407_vm8 = vcmask 392192   ;;  %vm409_vm9 = vcmask 523264   ;;  %vm411_vm10 = vcmask 654336  }
  0xc9   : > { %v311_v27 = vunpack.c.0.s8 %v310_v19  ;;  %s2173_s26 = smov 48   ;;  %s2174_s9 = smov 96   ;;  %vm413_vm11 = vcmask 785408   ;;  %vm415_vm12 = vcmask 916480   ;;  %vm1367_vm13 = vcmask 1043456  }
  0xca   : > { %s2175_s28 = smov 80   ;;  %s2176_s7 = smov 112  }
  0xcb   : > { %v2409_v40 = vsub.s32 %v311_v27, %v2390_v23  ;;  %s2177_s8 = smov 16   ;;  %p3035_p2 = scmp.ne.s32.totalorder %s3030_s11, 0 }
  0xcc   : > { %v2384_v20 = vld [vmem:[%s298_s10 + $0x30] sm:$0xff]  ;;  %v2386_v21 = vld [vmem:[%s298_s10] sm:$0xff]  ;;  %v2388_v22 = vld [vmem:[%s298_s10 + $0x48] sm:$0xff] }
  0xcd   : > { %425 = vrot.lane.b32.xlu1 %v2384_v20, %s2167_s6  ;;  %421 = vrot.lane.b32.xlu0 %v2386_v21, %s2167_s6  ;;  %v2396_v24 = vld [vmem:[%s298_s10 + $0x18] sm:$0xff]  ;;  %v302_v25 = vld [vmem:[%s298_s10 + $0x20] sm:$0x3]  ;;  %v656_v26 = vrot.slane %v2386_v21, 1  ;;  %v665_v28 = vrot.slane %v2388_v22, 1  ;;  %v662_v29 = vrot.slane %v2384_v20, 1  ;;  %v308_v34 = vcombine.high %v2386_v21, %v2384_v20 }
  0xce   : > { %v659_v30 = vrot.slane %v2396_v24, 1  ;;  %v660_v31 = vrot.slane %v302_v25, 1  ;;  %v300_v32 = vld [vmem:[%s298_s10 + $0x8] sm:$0x3]  ;;  %v306_v33 = vld [vmem:[%s298_s10 + $0x50] sm:$0x3]  ;;  %v324_v7 = vcombine.high %v2396_v24, %v2388_v22  ;;  %v307_v9 = vcombine.low %v2386_v21, %v2384_v20 }
  0xcf   : > { %v657_v35 = vrot.slane %v300_v32, 1  ;;  %v666_v36 = vrot.slane %v306_v33, 1  ;;  %v304_v37 = vld [vmem:[%s298_s10 + $0x38] sm:$0x3]  ;;  %v1009_v38 = vrot.slane %v2396_v24, 2  ;;  %v1010_v42 = vrot.slane %v302_v25, 2 }
  0xd0   : > { %v2406_v39 = vsel %vm655_vm3, %v659_v30, %v660_v31  ;;  %v663_v41 = vrot.slane %v304_v37, 1  ;;  %v1006_v45 = vrot.slane %v2386_v21, 2  ;;  %v1015_v46 = vrot.slane %v2388_v22, 2 }
  0xd1   : > { %427 = vrot.lane.b32.xlu1 %v2388_v22, %s2167_s6  ;;  %423 = vrot.lane.b32.xlu0 %v2396_v24, %s2167_s6  ;;  %v658_v43 = vsel %vm655_vm3, %v656_v26, %v657_v35  ;;  %v667_v44 = vsel %vm655_vm3, %v665_v28, %v666_v36  ;;  %v1007_v50 = vrot.slane %v300_v32, 2  ;;  %v1011_v53 = vsel %vm1005_vm4, %v1009_v38, %v1010_v42 }
  0xd2   : > { %v688_v47 = vcombine.low %v2406_v39, %v667_v44  ;;  %v689_v48 = vcombine.high %v2406_v39, %v667_v44  ;;  %v664_v49 = vsel %vm655_vm3, %v662_v29, %v663_v41  ;;  %v1016_v54 = vrot.slane %v306_v33, 2 }
  0xd3   : > { %v672_v51 = vcombine.low %v658_v43, %v664_v49  ;;  %v673_v52 = vcombine.high %v658_v43, %v664_v49  ;;  %v1012_v57 = vrot.slane %v2384_v20, 2  ;;  %v1013_v58 = vrot.slane %v304_v37, 2 }
  0xd4   : > { %v2424_v55 = vrot.slane %v688_v47, %v2409_v40  ;;  %v2427_v56 = vrot.slane %v689_v48, %v2409_v40  ;;  %v1017_v61 = vsel %vm1005_vm4, %v1015_v46, %v1016_v54  ;;  %v1008_v62 = vsel %vm1005_vm4, %v1006_v45, %v1007_v50 }
  0xd5   : > { %538 = vrot.lane.b32.xlu1 %v2396_v24, %s2168_s5  ;;  %536 = vrot.lane.b32.xlu0 %v2386_v21, %s2168_s5  ;;  %v2435_v59 = vrot.slane %v672_v51, %v2409_v40  ;;  %v2438_v60 = vrot.slane %v673_v52, %v2409_v40  ;;  %v1038_v63 = vcombine.low %v1011_v53, %v1017_v61  ;;  %v2169_v28 = vmov 1934713408  }
  0xd6   : > { %v1039_v0 = vcombine.high %v1011_v53, %v1017_v61  ;;  %v1014_v1 = vsel %vm1005_vm4, %v1012_v57, %v1013_v58  ;;  %v2448_v6 = vrot.slane %v308_v34, %v2409_v40  ;;  %v2457_v8 = vrot.slane %v324_v7, %v2409_v40 }
  0xd7   : > { %v1022_v2 = vcombine.low %v1008_v62, %v1014_v1  ;;  %v1023_v3 = vcombine.high %v1008_v62, %v1014_v1  ;;  %v705_v4 = vcombine.high %v2435_v59, %v2424_v55  ;;  %v720_v5 = vcombine.low %v2438_v60, %v2427_v56 }
  0xd8   : > { %v323_v10 = vcombine.low %v2396_v24, %v2388_v22  ;;  %v721_v11 = vcombine.high %v2438_v60, %v2427_v56  ;;  %v704_v12 = vcombine.low %v2435_v59, %v2424_v55  ;;  %v355_v13 = vcombine.low %v2448_v6, %v2457_v8 }
  0xd9   : > { %542 = vrot.lane.b32.xlu1 %v2388_v22, %s2168_s5  ;;  %540 = vrot.lane.b32.xlu0 %v2384_v20, %s2168_s5  ;;  %v2470_v14 = vrot.slane %v307_v9, %v2409_v40  ;;  %v356_v16 = vcombine.high %v2448_v6, %v2457_v8  ;;  %v2489_v19 = vrot.slane %v1038_v63, %v2409_v40  ;;  %v342_v29 = vunpack.c.l.s4 %v2169_v28 }
  0xda   : > { %v2473_v15 = vrot.slane %v323_v10, %v2409_v40  ;;  %v2492_v20 = vrot.slane %v1022_v2, %v2409_v40  ;;  %v2499_v22 = vrot.slane %v1039_v0, %v2409_v40  ;;  %v2502_v24 = vrot.slane %v1023_v3, %v2409_v40 }
  0xdb   : > { %v343_v32 = vunpack.c.0.s8 %v342_v29 }
  0xdc   : > { %v340_v17 = vcombine.high %v2470_v14, %v2473_v15  ;;  %v339_v18 = vcombine.low %v2470_v14, %v2473_v15  ;;  %v1055_v21 = vcombine.high %v2492_v20, %v2489_v19  ;;  %v1070_v25 = vcombine.low %v2502_v24, %v2499_v22 }
  0xdd   : > { %892 = vrot.lane.b32.xlu1 %v2406_v39, %s2168_s5  ;;  %890 = vrot.lane.b32.xlu0 %v658_v43, %s2168_s5  ;;  %v1071_v26 = vcombine.high %v2502_v24, %v2499_v22  ;;  %v1054_v27 = vcombine.low %v2492_v20, %v2489_v19 }
  0xe1   : > { %896 = vrot.lane.b32.xlu1 %v667_v44, %s2168_s5  ;;  %894 = vrot.lane.b32.xlu0 %v664_v49, %s2168_s5 }
  0xe5   : > { %1127 = vrot.lane.b32.xlu1 %v1011_v53, %s2167_s6  ;;  %1125 = vrot.lane.b32.xlu0 %v1008_v62, %s2167_s6 }
  0xe9   : > { %1131 = vrot.lane.b32.xlu1 %v1017_v61, %s2167_s6  ;;  %1129 = vrot.lane.b32.xlu0 %v1014_v1, %s2167_s6 }
  0xed   : > { %777 = vrot.lane.b32.xlu1 %v2406_v39, %s2167_s6  ;;  %775 = vrot.lane.b32.xlu0 %v658_v43, %s2167_s6  ;;  %v2520_v39 = vsub.s32 %v343_v32, %v2390_v23 }
  0xef   : > { %v2552_v29 = vrot.slane %v340_v17, %v2520_v39  ;;  %v2582_v56 = vrot.slane %v704_v12, %v2520_v39  ;;  %v2733_v22 = vrot.slane %v1054_v27, %v2520_v39 }
  0xf1   : > { %781 = vrot.lane.b32.xlu1 %v667_v44, %s2167_s6  ;;  %779 = vrot.lane.b32.xlu0 %v664_v49, %s2167_s6  ;;  %v719_v49 = vrot.slane %v705_v4, %v2520_v39 }
  0xf5   : > { %1242 = vrot.lane.b32.xlu1 %v1011_v53, %s2168_s5  ;;  %1240 = vrot.lane.b32.xlu0 %v1008_v62, %s2168_s5  ;;  %v728_v62 = vrot.slane %v720_v5, %v2520_v39  ;;  %v2546_v5 = vrot.slane %v355_v13, %v2520_v39 }
  0xf9   : > { %1246 = vrot.lane.b32.xlu1 %v1017_v61, %s2168_s5  ;;  %1244 = vrot.lane.b32.xlu0 %v1014_v1, %s2168_s5 }
 0x13f   : > { %v426_v30 = vpop.permute.xlu1 %425  ;;  %v422_v31 = vpop.permute.xlu0 %421 }
 0x140   : > { %v433_v33 = vcombine.low %v422_v31, %v426_v30  ;;  %v434_v34 = vcombine.high %v422_v31, %v426_v30 }
 0x142   : > { %v441_v41 = vrot.slane %v433_v33, %v2409_v40  ;;  %v448_v44 = vrot.slane %v434_v34, %v2409_v40  ;;  %v2172_v34 = vmov 0.0  }
 0x143   : > { %v428_v35 = vpop.permute.xlu1 %427  ;;  %v424_v36 = vpop.permute.xlu0 %423 }
 0x144   : > { %v449_v37 = vcombine.low %v424_v36, %v428_v35  ;;  %v450_v38 = vcombine.high %v424_v36, %v428_v35  ;;  %v737_v35 = vcombine.high %v719_v49, %v2172_v34  ;;  %v735_v36 = vrot.slane %v721_v11, %v2520_v39 }
 0x146   : > { %v457_v42 = vrot.slane %v449_v37, %v2409_v40  ;;  %v464_v43 = vrot.slane %v450_v38, %v2409_v40  ;;  %v739_v55 = vcombine.high %v735_v36, %v2172_v34 }
 0x147   : > { %v539_v45 = vpop.permute.xlu1 %538  ;;  %v537_v46 = vpop.permute.xlu0 %536 }
 0x148   : > { %v466_v47 = vcombine.high %v441_v41, %v457_v42  ;;  %v481_v48 = vcombine.low %v448_v44, %v464_v43  ;;  %v482_v7 = vcombine.high %v448_v44, %v464_v43  ;;  %v465_v13 = vcombine.low %v441_v41, %v457_v42 }
 0x14a   : > { %v480_v50 = vrot.slane %v466_v47, %v2520_v39  ;;  %v489_v61 = vrot.slane %v481_v48, %v2520_v39  ;;  %v496_v17 = vrot.slane %v482_v7, %v2520_v39  ;;  %v2585_v60 = vrot.slane %v465_v13, %v2520_v39 }
 0x14b   : > { %v543_v51 = vpop.permute.xlu1 %542  ;;  %v541_v52 = vpop.permute.xlu0 %540 }
 0x14c   : > { %v564_v23 = vcombine.low %v539_v45, %v543_v51  ;;  %v565_v53 = vcombine.high %v539_v45, %v543_v51  ;;  %v548_v54 = vcombine.low %v537_v46, %v541_v52  ;;  %v549_v57 = vcombine.high %v537_v46, %v541_v52 }
 0x14d   : > { %v1859_v58 = vpack.i.bf16 %v719_v49, %v480_v50  ;;  %v1869_v28 = vpack.i.bf16 %v728_v62, %v489_v61  ;;  %v498_v44 = vcombine.high %v480_v50, %v2172_v34  ;;  %v1879_v11 = vpack.i.bf16 %v735_v36, %v496_v17 }
 0x14e   : > { %v572_v63 = vrot.slane %v564_v23, %v2409_v40  ;;  %v579_v0 = vrot.slane %v565_v53, %v2409_v40  ;;  %v556_v1 = vrot.slane %v548_v54, %v2409_v40  ;;  %v563_v2 = vrot.slane %v549_v57, %v2409_v40 }
 0x14f   : > { %1860 = vrot.lane.b32.xlu1 %v1859_v58, %s2170_s30  ;;  %v2538_v3 = vpop.permute.xlu1 %892  ;;  %v2540_v4 = vpop.permute.xlu0 %890  ;;  %v738_v45 = vcombine.high %v728_v62, %v2172_v34  ;;  %v370_v46 = vrot.slane %v356_v16, %v2520_v39  ;;  %v1899_v48 = vpack.i.bf16 %v737_v35, %v498_v44  ;;  %v499_v49 = vcombine.high %v489_v61, %v2172_v34 }
 0x150   : > { %v581_v9 = vcombine.high %v556_v1, %v572_v63  ;;  %v596_v10 = vcombine.low %v563_v2, %v579_v0  ;;  %v597_v37 = vcombine.high %v563_v2, %v579_v0  ;;  %v580_v47 = vcombine.low %v556_v1, %v572_v63 }
 0x151   : > { %v736_v16 = vcombine.high %v2582_v56, %v2172_v34  ;;  %v500_v23 = vcombine.high %v496_v17, %v2172_v34  ;;  %v2608_v53 = vrot.slane %v339_v18, %v2520_v39  ;;  %v1909_v57 = vpack.i.bf16 %v738_v45, %v499_v49 }
 0x152   : > { %v2555_v30 = vrot.slane %v596_v10, %v2520_v39  ;;  %v2558_v31 = vrot.slane %v581_v9, %v2520_v39  ;;  %v611_v50 = vrot.slane %v597_v37, %v2520_v39  ;;  %v2611_v54 = vrot.slane %v580_v47, %v2520_v39 }
 0x153   : > { %1870 = vrot.lane.b32.xlu1 %v1869_v28, %s2171_s18  ;;  %v2561_v32 = vpop.permute.xlu1 %896  ;;  %v2563_v33 = vpop.permute.xlu0 %894  ;;  %v497_v61 = vcombine.high %v2585_v60, %v2172_v34  ;;  %v374_v0 = vcombine.high %v370_v46, %v2172_v34  ;;  %v371_v10 = vcombine.high %v2608_v53, %v2172_v34  ;;  %v1919_v13 = vpack.i.bf16 %v739_v55, %v500_v23 }
 0x154   : > { %v1874_v38 = vpack.i.bf16 %v2555_v30, %v2546_v5  ;;  %v1864_v43 = vpack.i.bf16 %v2558_v31, %v2552_v29  ;;  %v918_v59 = vcombine.low %v2538_v3, %v2561_v32  ;;  %v902_v12 = vcombine.low %v2540_v4, %v2563_v33 }
 0x155   : > { %v1884_v58 = vpack.i.bf16 %v611_v50, %v370_v46  ;;  %v615_v2 = vcombine.high %v611_v50, %v2172_v34  ;;  %v1889_v35 = vpack.i.bf16 %v736_v16, %v497_v61  ;;  %v612_v17 = vcombine.high %v2611_v54, %v2172_v34 }
 0x156   : > { %1865 = vrot.lane.b32.xlu0 %v1864_v43, %s2170_s30  ;;  %v2623_v14 = vrot.slane %v918_v59, %v2409_v40  ;;  %v2626_v15 = vrot.slane %v902_v12, %v2409_v40  ;;  %v919_v36 = vcombine.high %v2538_v3, %v2561_v32  ;;  %v903_v37 = vcombine.high %v2540_v4, %v2563_v33 }
 0x157   : > { %1875 = vrot.lane.b32.xlu1 %v1874_v38, %s2171_s18  ;;  %v1128_v41 = vpop.permute.xlu1 %1127  ;;  %v1126_v42 = vpop.permute.xlu0 %1125  ;;  %v372_v38 = vcombine.high %v2552_v29, %v2172_v34  ;;  %v613_v3 = vcombine.high %v2558_v31, %v2172_v34  ;;  %v1894_v46 = vpack.i.bf16 %v612_v17, %v371_v10  ;;  %v2660_v31 = vrot.slane %v1055_v21, %v2520_v39 }
 0x158   : > { %v935_v43 = vcombine.high %v2626_v15, %v2623_v14  ;;  %v373_v50 = vcombine.high %v2546_v5, %v2172_v34  ;;  %v933_v55 = vrot.slane %v919_v36, %v2409_v40  ;;  %v917_v59 = vrot.slane %v903_v37, %v2409_v40 }
 0x159   : > { %v614_v5 = vcombine.high %v2555_v30, %v2172_v34 }
 0x15a   : > { %1880 = vrot.lane.b32.xlu0 %v1879_v11, %s2174_s9 }
 0x15b   : > { %1900 = vrot.lane.b32.xlu1 %v1899_v48, %s2173_s26  ;;  %v1132_v6 = vpop.permute.xlu1 %1131  ;;  %v1130_v8 = vpop.permute.xlu0 %1129 }
 0x15c   : > { %v1153_v51 = vcombine.low %v1128_v41, %v1132_v6  ;;  %v1137_v52 = vcombine.low %v1126_v42, %v1130_v8  ;;  %v1154_v7 = vcombine.high %v1128_v41, %v1132_v6  ;;  %v1138_v9 = vcombine.high %v1126_v42, %v1130_v8 }
 0x15d   : > { %v1924_v42 = vpack.i.bf16 %v615_v2, %v374_v0  ;;  %v949_v8 = vrot.slane %v935_v43, %v2520_v39  ;;  %v950_v0 = vcombine.low %v917_v59, %v933_v55 }
 0x15e   : > { %v2616_v62 = vrot.slane %v1153_v51, %v2409_v40  ;;  %v2619_v63 = vrot.slane %v1137_v52, %v2409_v40  ;;  %1885 = vrot.lane.b32.xlu0 %v1884_v58, %s2174_s9  ;;  %v1168_v4 = vrot.slane %v1154_v7, %v2409_v40  ;;  %v1152_v32 = vrot.slane %v1138_v9, %v2409_v40 }
 0x15f   : > { %1910 = vrot.lane.b32.xlu1 %v1909_v57, %s2175_s28  ;;  %v778_v18 = vpop.permute.xlu1 %777  ;;  %v776_v1 = vpop.permute.xlu0 %775  ;;  %v1904_v51 = vpack.i.bf16 %v613_v3, %v372_v38  ;;  %v1914_v9 = vpack.i.bf16 %v614_v5, %v373_v50  ;;  %v958_v38 = vrot.slane %v950_v0, %v2520_v39 }
 0x160   : > { %v1170_v28 = vcombine.high %v2619_v63, %v2616_v62  ;;  %v1185_v16 = vcombine.low %v1152_v32, %v1168_v4  ;;  %v1186_v52 = vcombine.high %v1152_v32, %v1168_v4  ;;  %v1169_v43 = vcombine.low %v2619_v63, %v2616_v62 }
 0x161   : > { %v968_v50 = vcombine.high %v958_v38, %v2172_v34 }
 0x162   : > { %1890 = vrot.lane.b32.xlu0 %v1889_v35, %s2177_s8  ;;  %v1184_v47 = vrot.slane %v1170_v28, %v2520_v39  ;;  %v1193_v35 = vrot.slane %v1185_v16, %v2520_v39 }
 0x163   : > { %1920 = vrot.lane.b32.xlu1 %v1919_v13, %s2176_s7  ;;  %v782_v44 = vpop.permute.xlu1 %781  ;;  %v780_v41 = vpop.permute.xlu0 %779  ;;  %v1200_v13 = vrot.slane %v1186_v52, %v2520_v39 }
 0x164   : > { %v803_v29 = vcombine.low %v778_v18, %v782_v44  ;;  %v787_v33 = vcombine.low %v776_v1, %v780_v41  ;;  %v804_v11 = vcombine.high %v778_v18, %v782_v44  ;;  %v788_v45 = vcombine.high %v776_v1, %v780_v41 }
 0x165   : > { %v1929_v58 = vpack.i.bf16 %v1184_v47, %v949_v8  ;;  %v951_v18 = vcombine.high %v917_v59, %v933_v55  ;;  %v1078_v41 = vrot.slane %v1070_v25, %v2520_v39  ;;  %v1939_v4 = vpack.i.bf16 %v1193_v35, %v958_v38  ;;  %v1514_v38 = vld [vmem:[%s3019_s2 + $0x10] sm:$0xff] }
 0x166   : > { %v2653_v48 = vrot.slane %v803_v29, %v2409_v40  ;;  %v795_v49 = vrot.slane %v787_v33, %v2409_v40  ;;  %1895 = vrot.lane.b32.xlu0 %v1894_v46, %s2177_s8  ;;  %v818_v23 = vrot.slane %v804_v11, %v2409_v40  ;;  %v802_v57 = vrot.slane %v788_v45, %v2409_v40 }
 0x167   : > { %1925 = vrot.lane.b32.xlu1 %v1924_v42, %s2176_s7  ;;  %v2668_v12 = vpop.permute.xlu1 %1242  ;;  %v2670_v6 = vpop.permute.xlu0 %1240  ;;  %v965_v37 = vrot.slane %v951_v18, %v2520_v39  ;;  %v934_v29 = vcombine.low %v2626_v15, %v2623_v14  ;;  %v1202_v63 = vcombine.high %v1184_v47, %v2172_v34  ;;  %v1085_v25 = vrot.slane %v1071_v26, %v2520_v39 }
 0x168   : > { %v820_v21 = vcombine.high %v795_v49, %v2653_v48  ;;  %v835_v10 = vcombine.low %v802_v57, %v818_v23  ;;  %v836_v42 = vcombine.high %v802_v57, %v818_v23  ;;  %v2719_v33 = vrot.slane %v1169_v43, %v2520_v39 }
 0x169   : > { %v1949_v3 = vpack.i.bf16 %v1200_v13, %v965_v37  ;;  %v819_v11 = vcombine.low %v795_v49, %v2653_v48  ;;  %v967_v15 = vcombine.high %v949_v8, %v2172_v34  ;;  %v2725_v46 = vrot.slane %v934_v29, %v2520_v39 }
 0x16a   : > { %v2679_v61 = vrot.slane %v820_v21, %v2520_v39  ;;  %1905 = vrot.lane.b32.xlu0 %v1904_v51, %s2173_s26  ;;  %v843_v32 = vrot.slane %v835_v10, %v2520_v39  ;;  %v850_v14 = vrot.slane %v836_v42, %v2520_v39  ;;  %v1203_v48 = vcombine.high %v1193_v35, %v2172_v34  ;;  %v1372_v35 = vld [vmem:[%s3018_s1] sm:$0xff]  ;;  %v1541_v42 = vld [vmem:[%s3020_s3 + $0x8] sm:$0xff] }
 0x16b   : > { %1930 = vrot.lane.b32.xlu1 %v1929_v58, %s2170_s30  ;;  %v1247_v1 = vpop.permute.xlu1 %1246  ;;  %v1245_v2 = vpop.permute.xlu0 %1244  ;;  %v1969_v47 = vpack.i.bf16 %v1202_v63, %v967_v15  ;;  %v2736_v24 = vrot.slane %v819_v11, %v2520_v39  ;;  %v1201_v49 = vcombine.high %v2719_v33, %v2172_v34  ;;  %v966_v19 = vcombine.high %v2725_v46, %v2172_v34 }
 0x16c   : > { %v1268_v7 = vcombine.low %v2668_v12, %v1247_v1  ;;  %v1252_v30 = vcombine.low %v2670_v6, %v1245_v2  ;;  %v1934_v28 = vpack.i.bf16 %v2660_v31, %v2679_v61  ;;  %v1944_v45 = vpack.i.bf16 %v1078_v41, %v843_v32  ;;  %1717 = vmatprep.mubr.msk.f32.mxu0 %vm1376_vm5, %v1372_v35 }
 0x16d   : > { %v1954_v26 = vpack.i.bf16 %v1085_v25, %v850_v14  ;;  %v1269_v20 = vcombine.high %v2668_v12, %v1247_v1  ;;  %v1204_v27 = vcombine.high %v1200_v13, %v2172_v34  ;;  %v1086_v55 = vcombine.high %v2733_v22, %v2172_v34 }
 0x16e   : > { %v2690_v17 = vrot.slane %v1268_v7, %v2409_v40  ;;  %v2693_v36 = vrot.slane %v1252_v30, %v2409_v40  ;;  %1915 = vrot.lane.b32.xlu0 %v1914_v9, %s2175_s28  ;;  %v1253_v59 = vcombine.high %v2670_v6, %v1245_v2  ;;  %v1979_v8 = vpack.i.bf16 %v1203_v48, %v968_v50 }
 0x16f   : > { %1935 = vrot.lane.b32.xlu1 %v1934_v28, %s2170_s30  ;;  %v1959_v16 = vpack.i.bf16 %v1201_v49, %v966_v19  ;;  %v851_v21 = vcombine.high %v2736_v24, %v2172_v34  ;;  %v969_v51 = vcombine.high %v965_v37, %v2172_v34  ;;  %v1283_v12 = vrot.slane %v1269_v20, %v2409_v40 }
 0x170   : > { %v1285_v44 = vcombine.high %v2693_v36, %v2690_v17  ;;  %v1089_v52 = vcombine.high %v1085_v25, %v2172_v34  ;;  %v1087_v23 = vcombine.high %v2660_v31, %v2172_v34  ;;  %v1267_v6 = vrot.slane %v1253_v59, %v2409_v40 }
 0x171   : > { %v1989_v5 = vpack.i.bf16 %v1204_v27, %v969_v51  ;;  %v1964_v57 = vpack.i.bf16 %v1086_v55, %v851_v21  ;;  %v854_v58 = vcombine.high %v850_v14, %v2172_v34  ;;  %v852_v0 = vcombine.high %v2679_v61, %v2172_v34 }
 0x172   : > { %1940 = vrot.lane.b32.xlu0 %v1939_v4, %s2171_s18  ;;  %v1299_v62 = vrot.slane %v1285_v44, %v2520_v39  ;;  %v1284_v18 = vcombine.low %v2693_v36, %v2690_v17  ;;  %v1088_v1 = vcombine.high %v1078_v41, %v2172_v34  ;;  %v1300_v2 = vcombine.low %v1267_v6, %v1283_v12  ;;  %v1512_v36 = vld [vmem:[%s3019_s2] sm:$0xff]  ;;  %v1515_v44 = vld [vmem:[%s3019_s2 + $0x18] sm:$0xff] }
 0x173   : > { %1950 = vrot.lane.b32.xlu1 %v1949_v3, %s2174_s9  ;;  %v1994_v7 = vpack.i.bf16 %v1089_v52, %v854_v58  ;;  %v1974_v31 = vpack.i.bf16 %v1087_v23, %v852_v0  ;;  %v853_v40 = vcombine.high %v843_v32, %v2172_v34  ;;  %v1301_v30 = vcombine.high %v1267_v6, %v1283_v12  ;;  %v1513_v3 = vld [vmem:[%s3019_s2 + $0x8] sm:$0xff]  ;;  %v1543_v4 = vld [vmem:[%s3020_s3 + $0x18] sm:$0xff]  ;;  %v1542_v32 = vld [vmem:[%s3020_s3 + $0x10] sm:$0xff] }
 0x174   : > { %v1308_v61 = vrot.slane %v1300_v2, %v2520_v39  ;;  %v2774_v10 = vrot.slane %v1284_v18, %v2520_v39  ;;  %v1317_v17 = vcombine.high %v1299_v62, %v2172_v34  ;;  %v2178_v37 = vmov 0  }
 0x175   : > { %v1984_v9 = vpack.i.bf16 %v1088_v1, %v853_v40  ;;  %v1315_v28 = vrot.slane %v1301_v30, %v2520_v39  ;;  %v1374_v39 = vld [vmem:[%s3018_s1 + $0x10] sm:$0xff]  ;;  %1999 = vset.pattern.permute.xlu1 %v2178_v37  ;;  %2000 = vset.pattern.permute.xlu0 %v2178_v37 }
 0x176   : > { %1945 = vrot.lane.b32.xlu0 %v1944_v45, %s2171_s18  ;;  %v1316_v13 = vcombine.high %v2774_v10, %v2172_v34  ;;  %1720 = vmatprep.mubr.msk.f32.mxu1 %vm1376_vm5, %v1374_v39  ;;  %v1318_v43 = vcombine.high %v1308_v61, %v2172_v34 }
 0x177   : > { %1325 = vrot.lane.b32.xlu1 %v1299_v62, %s2170_s30  ;;  %v1319_v41 = vcombine.high %v1315_v28, %v2172_v34  ;;  %v1540_v34 = vld [vmem:[%s3020_s3] sm:$0xff]  ;;  %s1693_s30 = sshll.u32 %s2147_s22, 3 }
 0x17a   : > { %1955 = vrot.lane.b32.xlu0 %v1954_v26, %s2174_s9 }
 0x17b   : > { %1970 = vrot.lane.b32.xlu1 %v1969_v47, %s2173_s26 }
 0x17e   : > { %1960 = vrot.lane.b32.xlu0 %v1959_v16, %s2177_s8 }
 0x17f   : > { %1980 = vrot.lane.b32.xlu1 %v1979_v8, %s2175_s28 }
 0x182   : > { %1965 = vrot.lane.b32.xlu0 %v1964_v57, %s2177_s8 }
 0x183   : > { %1990 = vrot.lane.b32.xlu1 %v1989_v5, %s2176_s7 }
 0x186   : > { %1975 = vrot.lane.b32.xlu0 %v1974_v31, %s2173_s26 }
 0x187   : > { %1995 = vrot.lane.b32.xlu1 %v1994_v7, %s2176_s7 }
 0x18a   : > { %1985 = vrot.lane.b32.xlu0 %v1984_v9, %s2175_s28 }
 0x18b   : > { %1333 = vrot.lane.b32.xlu1 %v1308_v61, %s2171_s18  ;;  %s1587_s18 = sshll.u32 %s2364_s29, 4  ;;  %s2943_s18 = int_to_ptr.vmem [resolvable:$true] %s1587_s18 }
 0x18c   : > { %s2037_s27 = scalar_lea.vmem %s2943_s18, 512 }
 0x18d   : > { %p2038_p7 = scmp.ne.s32.totalorder %s2943_s18, %s2037_s27 }
 0x18e   : > { %1321 = vrot.lane.b32.xlu0 %v1316_v13, %s2177_s8 }
 0x18f   : > { %1341 = vrot.lane.b32.xlu1 %v1315_v28, %s2174_s9  ;;  %p2039_p4 = pnand %p2038_p7, %p3035_p2 }
 0x191   : > { %p2040_p0 = pneg %p2039_p4 }
 0x192   : > { %1329 = vrot.lane.b32.xlu0 %v1317_v17, %s2173_s26  ;;  %s2179_s26 = smov [#allocation6]  }
 0x193   : > { %1518 = vperm.xlu1 %1999, %v1512_v36   ;;  %s2041_s6 = sshll.u32 %s2179_s26, 4  ;;  %s2042_s6 = int_to_ptr.vmem [resolvable:$false] %s2041_s6 }
 0x194   : > { %s2043_s5 = scalar_lea.vmem %s2042_s6, 1024  ;;  %p2044_p1 = scmp.lt.s32.totalorder %s2943_s18, %s2042_s6 }
 0x195   : > { %p2045_p6 = scmp.lt.s32.totalorder %s2043_s5, %s2037_s27 }
 0x196   : > { %1337 = vrot.lane.b32.xlu0 %v1318_v43, %s2175_s28  ;;  %s1584_s28 = sadd.s32 %s2143_s21, %s1693_s30 }
 0x197   : > { %1528 = vperm.xlu1 %1999, %v1514_v38   ;;  %s1694_s9 = sshll.u32 %s1584_s28, 7  ;;  %p2046_p9 = por %p2045_p6, %p2044_p1 }
 0x198   : > { %s2948_s8 = scalar_lea.hbm %s3021_s4, %s1694_s9 }
 0x199   : > { %p2047_p3 = pnand %p2046_p9, %p2040_p0 }
 0x19a   : > { %1345 = vrot.lane.b32.xlu0 %v1319_v41, %s2176_s7  ;;  %s3034_s7 = sand.u32 1, %s2123_s16  }
 0x19b   : > { %1533 = vperm.xlu1 %1999, %v1515_v44   ;;  %s2956_s10 = scalar_lea.sflag [#allocation5], %s3034_s7 }
 0x19e   : > { %1523 = vperm.xlu0 %2000, %v1513_v3  }
 0x19f   : > { %1551 = vperm.xlu1 %1999, %v1541_v42  }
 0x1a2   : > { %1546 = vperm.xlu0 %2000, %v1540_v34  }
 0x1a3   : > { %1561 = vperm.xlu1 %1999, %v1543_v4  }
 0x1a6   : > { %1556 = vperm.xlu0 %2000, %v1542_v32  }
 0x1c1   : > { %v1861_v29 = vpop.permute.xlu1 %1860 }
 0x1c2   : > { %v1863_v50 = vunpack.i.h.bf16 %v1861_v29  ;;  %v1862_v19 = vunpack.i.l.bf16 %v1861_v29 }
 0x1c5   : > { %v1871_v62 = vpop.permute.xlu1 %1870 }
 0x1c6   : > { %v1873_v8 = vunpack.i.h.bf16 %v1871_v62  ;;  %v1872_v16 = vunpack.i.l.bf16 %v1871_v62 }
 0x1c8   : > { %v1866_v25 = vpop.permute.xlu0 %1865 }
 0x1c9   : > { %v2821_v63 = vpop.permute.xlu1 %1875  ;;  %v1868_v18 = vunpack.i.h.bf16 %v1866_v25  ;;  %v1867_v1 = vunpack.i.l.bf16 %v1866_v25 }
 0x1ca   : > { %v1878_v38 = vunpack.i.h.bf16 %v2821_v63  ;;  %v1877_v43 = vunpack.i.l.bf16 %v2821_v63 }
 0x1cc   : > { %v1881_v45 = vpop.permute.xlu0 %1880 }
 0x1cd   : > { %v1901_v11 = vpop.permute.xlu1 %1900  ;;  %v1883_v9 = vunpack.i.h.bf16 %v1881_v45  ;;  %v1882_v28 = vunpack.i.l.bf16 %v1881_v45 }
 0x1ce   : > { %v1903_v20 = vunpack.i.h.bf16 %v1901_v11  ;;  %v1902_v27 = vunpack.i.l.bf16 %v1901_v11 }
 0x1d0   : > { %v2823_v15 = vpop.permute.xlu0 %1885 }
 0x1d1   : > { %v1911_v14 = vpop.permute.xlu1 %1910  ;;  %v1888_v4 = vunpack.i.h.bf16 %v2823_v15  ;;  %v1887_v34 = vunpack.i.l.bf16 %v2823_v15 }
 0x1d2   : > { %v1913_v52 = vunpack.i.h.bf16 %v1911_v14  ;;  %v1912_v23 = vunpack.i.l.bf16 %v1911_v14 }
 0x1d4   : > { %v1891_v26 = vpop.permute.xlu0 %1890 }
 0x1d5   : > { %v2825_v47 = vpop.permute.xlu1 %1920  ;;  %v1893_v48 = vunpack.i.h.bf16 %v1891_v26  ;;  %v1892_v49 = vunpack.i.l.bf16 %v1891_v26 }
 0x1d6   : > { %v1923_v44 = vunpack.i.h.bf16 %v2825_v47  ;;  %v1922_v41 = vunpack.i.l.bf16 %v2825_v47 }
 0x1d7   : > { %v768_v55 = vsel %vm403_vm6, %v2582_v56, %v1893_v48  ;;  %v529_v59 = vsel %vm403_vm6, %v2585_v60, %v1892_v49 }
 0x1d8   : > { %v769_v21 = vsel %vm405_vm7, %v768_v55, %v1863_v50  ;;  %v530_v51 = vsel %vm405_vm7, %v529_v59, %v1862_v19  ;;  %v1896_v5 = vpop.permute.xlu0 %1895 }
 0x1d9   : > { %v1926_v12 = vpop.permute.xlu1 %1925  ;;  %v770_v6 = vsel %vm407_vm8, %v769_v21, %v1903_v20  ;;  %v531_v57 = vsel %vm407_vm8, %v530_v51, %v1902_v27  ;;  %v1898_v0 = vunpack.i.h.bf16 %v1896_v5  ;;  %v1897_v60 = vunpack.i.l.bf16 %v1896_v5 }
 0x1da   : > { %v771_v58 = vsel %vm409_vm9, %v770_v6, %v1873_v8  ;;  %v532_v56 = vsel %vm409_vm9, %v531_v57, %v1872_v16  ;;  %v1928_v47 = vunpack.i.h.bf16 %v1926_v12  ;;  %v1927_v26 = vunpack.i.l.bf16 %v1926_v12 }
 0x1db   : > { %v772_v2 = vsel %vm411_vm10, %v771_v58, %v1913_v52  ;;  %v533_v7 = vsel %vm411_vm10, %v532_v56, %v1912_v23  ;;  %v644_v31 = vsel %vm403_vm6, %v2611_v54, %v1898_v0  ;;  %v404_v40 = vsel %vm403_vm6, %v2608_v53, %v1897_v60 }
 0x1dc   : > { %v1906_v61 = vpop.permute.xlu0 %1905  ;;  %v406_v17 = vsel %vm405_vm7, %v404_v40, %v1867_v1  ;;  %v645_v39 = vsel %vm405_vm7, %v644_v31, %v1868_v18  ;;  %v534_v54 = vsel %vm413_vm11, %v533_v7, %v1882_v28  ;;  %v773_v53 = vsel %vm413_vm11, %v772_v2, %v1883_v9 }
 0x1dd   : > { %v2843_v30 = vpop.permute.xlu1 %1930  ;;  %v1908_v13 = vunpack.i.h.bf16 %v1906_v61  ;;  %v1907_v35 = vunpack.i.l.bf16 %v1906_v61  ;;  %v535_v11 = vsel %vm415_vm12, %v534_v54, %v1922_v41  ;;  %v774_v63 = vsel %vm415_vm12, %v773_v53, %v1923_v44 }
 0x1de   : > { %v1356_v19 = vrot.slane %v535_v11, 4  ;;  %v1359_v20 = vrot.slane %v774_v63, 4  ;;  %v1933_v58 = vunpack.i.h.bf16 %v2843_v30  ;;  %v1932_v56 = vunpack.i.l.bf16 %v2843_v30 }
 0x1df   : > { %v408_v36 = vsel %vm407_vm8, %v406_v17, %v1907_v35  ;;  %v646_v37 = vsel %vm407_vm8, %v645_v39, %v1908_v13 }
 0x1e0   : > { %v1916_v3 = vpop.permute.xlu0 %1915  ;;  %v410_v62 = vsel %vm409_vm9, %v408_v36, %v1877_v43  ;;  %v647_v25 = vsel %vm409_vm9, %v646_v37, %v1878_v38 }
 0x1e1   : > { %v2855_v42 = vpop.permute.xlu1 %1935  ;;  %v1918_v32 = vunpack.i.h.bf16 %v1916_v3  ;;  %v1917_v29 = vunpack.i.l.bf16 %v1916_v3 }
 0x1e2   : > { %v1938_v41 = vunpack.i.h.bf16 %v2855_v42  ;;  %v1937_v3 = vunpack.i.l.bf16 %v2855_v42 }
 0x1e3   : > { %v412_v45 = vsel %vm411_vm10, %v410_v62, %v1917_v29  ;;  %v648_v14 = vsel %vm411_vm10, %v647_v25, %v1918_v32 }
 0x1e4   : > { %v414_v48 = vsel %vm413_vm11, %v412_v45, %v1887_v34  ;;  %v649_v15 = vsel %vm413_vm11, %v648_v14, %v1888_v4  ;;  %v1941_v50 = vpop.permute.xlu0 %1940 }
 0x1e5   : > { %v1951_v49 = vpop.permute.xlu1 %1950  ;;  %v416_v27 = vsel %vm415_vm12, %v414_v48, %v1927_v26  ;;  %v650_v55 = vsel %vm415_vm12, %v649_v15, %v1928_v47  ;;  %v1943_v2 = vunpack.i.h.bf16 %v1941_v50  ;;  %v1942_v7 = vunpack.i.l.bf16 %v1941_v50 }
 0x1e6   : > { %v1368_v59 = vsel %vm1367_vm13, %v416_v27, %v1356_v19  ;;  %v1369_v8 = vsel %vm1367_vm13, %v650_v55, %v1359_v20  ;;  %v1953_v54 = vunpack.i.h.bf16 %v1951_v49  ;;  %v1952_v53 = vunpack.i.l.bf16 %v1951_v49 }
 0x1e7   : > { %v1723_v51 = vpack.c.bf16 %v1369_v8, %v1368_v59 }
 0x1e8   : > { %v2873_v21 = vpop.permute.xlu0 %1945 }
 0x1e9   : > { %v2871_v16 = vpop.permute.xlu1 %1325  ;;  %1724 = vmatprep.subr.bf16.mxu0 %v1723_v51  ;;  %1731 = vmatprep.subr.bf16.mxu1 %v1723_v51  ;;  %v1948_v63 = vunpack.i.h.bf16 %v2873_v21 }
 0x1ea   : > { %1726 = vmatpush3.bf16.msra.mxu0 %v1723_v51  ;;  %1734 = vmatpush3.bf16.msra.mxu1 %v1723_v51 }
 0x1ec   : > { %v2875_v5 = vpop.permute.xlu0 %1955 }
 0x1ed   : > { %v1971_v12 = vpop.permute.xlu1 %1970  ;;  %v1958_v50 = vunpack.i.h.bf16 %v2875_v5  ;;  %v1957_v19 = vunpack.i.l.bf16 %v2875_v5 }
 0x1ee   : > { %v1973_v0 = vunpack.i.h.bf16 %v1971_v12  ;;  %v1972_v60 = vunpack.i.l.bf16 %v1971_v12 }
 0x1f0   : > { %v1961_v23 = vpop.permute.xlu0 %1960 }
 0x1f1   : > { %v1981_v52 = vpop.permute.xlu1 %1980  ;;  %v1963_v6 = vunpack.i.h.bf16 %v1961_v23  ;;  %v1962_v57 = vunpack.i.l.bf16 %v1961_v23 }
 0x1f2   : > { %v1983_v9 = vunpack.i.h.bf16 %v1981_v52  ;;  %v1982_v28 = vunpack.i.l.bf16 %v1981_v52 }
 0x1f3   : > { %v1233_v18 = vsel %vm403_vm6, %v2719_v33, %v1963_v6  ;;  %v998_v1 = vsel %vm403_vm6, %v2725_v46, %v1962_v57 }
 0x1f4   : > { %v1234_v31 = vsel %vm405_vm7, %v1233_v18, %v1933_v58  ;;  %v999_v40 = vsel %vm405_vm7, %v998_v1, %v1932_v56  ;;  %v1966_v61 = vpop.permute.xlu0 %1965 }
 0x1f5   : > { %v1235_v13 = vsel %vm407_vm8, %v1234_v31, %v1973_v0  ;;  %v1000_v30 = vsel %vm407_vm8, %v999_v40, %v1972_v60  ;;  %v1991_v35 = vpop.permute.xlu1 %1990  ;;  %v1968_v39 = vunpack.i.h.bf16 %v1966_v61  ;;  %v1967_v46 = vunpack.i.l.bf16 %v1966_v61 }
 0x1f6   : > { %v1001_v17 = vsel %vm409_vm9, %v1000_v30, %v1942_v7  ;;  %v1236_v33 = vsel %vm409_vm9, %v1235_v13, %v1943_v2  ;;  %v1993_v62 = vunpack.i.h.bf16 %v1991_v35  ;;  %v1992_v25 = vunpack.i.l.bf16 %v1991_v35  ;;  %v1375_v30 = vld [vmem:[%s3018_s1 + $0x18] sm:$0xff] }
 0x1f7   : > { %v1002_v36 = vsel %vm411_vm10, %v1001_v17, %v1982_v28  ;;  %v1237_v37 = vsel %vm411_vm10, %v1236_v33, %v1983_v9  ;;  %v1118_v38 = vsel %vm403_vm6, %v2733_v22, %v1968_v39  ;;  %v883_v43 = vsel %vm403_vm6, %v2736_v24, %v1967_v46 }
 0x1f8   : > { %v1976_v44 = vpop.permute.xlu0 %1975  ;;  %v1003_v4 = vsel %vm413_vm11, %v1002_v36, %v1952_v53  ;;  %v1238_v34 = vsel %vm413_vm11, %v1237_v37, %v1953_v54  ;;  %v884_v11 = vsel %vm405_vm7, %v883_v43, %v1937_v3  ;;  %v1119_v22 = vsel %vm405_vm7, %v1118_v38, %v1938_v41 }
 0x1f9   : > { %v1978_v32 = vunpack.i.h.bf16 %v1976_v44  ;;  %v1977_v29 = vunpack.i.l.bf16 %v1976_v44  ;;  %v1947_v24 = vunpack.i.l.bf16 %v2873_v21  ;;  %v1996_v45 = vpop.permute.xlu1 %1995  ;;  %v1004_v26 = vsel %vm415_vm12, %v1003_v4, %v1992_v25 }
 0x1fa   : > { %v1239_v48 = vsel %vm415_vm12, %v1238_v34, %v1993_v62  ;;  %v1998_v55 = vunpack.i.h.bf16 %v1996_v45  ;;  %v1997_v59 = vunpack.i.l.bf16 %v1996_v45  ;;  %v1362_v51 = vrot.slane %v1004_v26, 4 }
 0x1fb   : > { %v885_v14 = vsel %vm407_vm8, %v884_v11, %v1977_v29  ;;  %v1120_v42 = vsel %vm407_vm8, %v1119_v22, %v1978_v32  ;;  %v1365_v12 = vrot.slane %v1239_v48, 4 }
 0x1fc   : > { %v1986_v47 = vpop.permute.xlu0 %1985  ;;  %v886_v20 = vsel %vm409_vm9, %v885_v14, %v1947_v24  ;;  %v1121_v27 = vsel %vm409_vm9, %v1120_v42, %v1948_v63 }
 0x1fd   : > { %v1988_v15 = vunpack.i.h.bf16 %v1986_v47  ;;  %v1987_v49 = vunpack.i.l.bf16 %v1986_v47  ;;  %v1334_v2 = vpop.permute.xlu1 %1333 }
 0x1ff   : > { %v887_v8 = vsel %vm411_vm10, %v886_v20, %v1987_v49  ;;  %v1122_v21 = vsel %vm411_vm10, %v1121_v27, %v1988_v15 }
 0x200   : > { %v888_v52 = vsel %vm413_vm11, %v887_v8, %v1957_v19  ;;  %v1123_v23 = vsel %vm413_vm11, %v1122_v21, %v1958_v50  ;;  %v1322_v6 = vpop.permute.xlu0 %1321 }
 0x201   : > { %v1348_v5 = vsel %vm403_vm6, %v2774_v10, %v1322_v6  ;;  %v889_v57 = vsel %vm415_vm12, %v888_v52, %v1997_v59  ;;  %v1124_v58 = vsel %vm415_vm12, %v1123_v23, %v1998_v55  ;;  %v1342_v61 = vpop.permute.xlu1 %1341 }
 0x202   : > { %v1370_v56 = vsel %vm1367_vm13, %v889_v57, %v1362_v51  ;;  %v1371_v0 = vsel %vm1367_vm13, %v1124_v58, %v1365_v12  ;;  %v1349_v18 = vsel %vm405_vm7, %v1348_v5, %v2871_v16  ;;  %v1373_v16 = vld [vmem:[%s3018_s1 + $0x8] sm:$0xff] }
 0x203   : > { %v1727_v60 = vpack.c.bf16 %v1371_v0, %v1370_v56 }
 0x204   : > { %v1330_v1 = vpop.permute.xlu0 %1329 }
 0x205   : > { %v1350_v7 = vsel %vm407_vm8, %v1349_v18, %v1330_v1  ;;  %1728 = vmatprep.subr.bf16.mxu0 %v1727_v60  ;;  %1732 = vmatprep.subr.bf16.mxu1 %v1727_v60 }
 0x206   : > { %1730 = vmatpush3.bf16.msra.mxu0 %v1727_v60  ;;  %1735 = vmatpush3.bf16.msra.mxu1 %v1727_v60  ;;  %v1351_v10 = vsel %vm409_vm9, %v1350_v7, %v1334_v2 }
 0x208   : > { %v1338_v31 = vpop.permute.xlu0 %1337 }
 0x209   : > { %v1352_v40 = vsel %vm411_vm10, %v1351_v10, %v1338_v31 }
 0x20a   : > { %v1353_v9 = vsel %vm413_vm11, %v1352_v40, %v1342_v61 }
 0x20c   : > { %v1346_v28 = vpop.permute.xlu0 %1345 }
 0x20d   : > { %v1354_v13 = vsel %vm415_vm12, %v1353_v9, %v1346_v28 }
 0x20e   : > { %1715 = vmatprep.subr.msk.mxu0 %vm1367_vm13, %v1354_v13  ;;  %1733 = vmatprep.subr.msk.mxu1 %vm1367_vm13, %v1354_v13 }
 0x20f   : > { %1716 = vmatpush3.msk.msra.mxu0 %vm1367_vm13, %v1354_v13  ;;  %1736 = vmatpush3.msk.msra.mxu1 %vm1367_vm13, %v1354_v13 }
 0x210   : > { %1718 = vmatmul.mubr.msk.f32.vlgmr.msra.gmra.mrb[0].mxu0 %vm1376_vm5, %v1373_v16  ;;  %1721 = vmatmul.mubr.msk.f32.vlgmr.msra.gmra.mrb[0].mxu1 %vm1376_vm5, %v1375_v30 }
 0x212   : > { %v1519_v48 = vpop.permute.xlu1 %1518 }
 0x216   : > { %v1529_v19 = vpop.permute.xlu1 %1528 }
 0x21a   : > { %v1534_v27 = vpop.permute.xlu1 %1533 }
 0x21d   : > { %v1524_v55 = vpop.permute.xlu0 %1523 }
 0x21e   : > { %v1552_v59 = vpop.permute.xlu1 %1551 }
 0x221   : > { %v1547_v8 = vpop.permute.xlu0 %1546 }
 0x222   : > { %v1562_v56 = vpop.permute.xlu1 %1561 }
 0x225   : > { %v1557_v0 = vpop.permute.xlu0 %1556 }
 0x2e3   : > { %v1719_v35 = vpop.f32.mrb[0].mxu0  ;;  %v1722_v17 = vpop.f32.mrb[0].mxu1 }
 0x2e4   : > { %v1458_v33 = vpop.f32.mrb[1].mxu0  ;;  %v1468_v39 = vpop.f32.mrb[1].mxu1 }
 0x2e5   : > { %v1477_v46 = vadd.f32 %v1719_v35, %v1458_v33 }
 0x2e7   : > { %v1478_v36 = vadd.f32 %v1477_v46, %v1468_v39 }
 0x2e9   : > { %v1479_v37 = vadd.f32 %v1722_v17, %v1478_v36 }
 0x2eb   : > { %v1480_v54 = vrot.slane %v1479_v37, 4 }
 0x2ed   : > { %v1481_v53 = vadd.f32 %v1480_v54, %v1479_v37 }
 0x2ef   : > { %v1482_v38 = vrot.slane %v1481_v53, 2 }
 0x2f1   : > { %v1483_v43 = vadd.f32 %v1482_v38, %v1481_v53 }
 0x2f3   : > { %v1484_v44 = vrot.slane %v1483_v43, 1 }
 0x2f5   : > { %v1485_v41 = vadd.f32 %v1484_v44, %v1483_v43 }
 0x2f7   : > { %v1487_v3 = vmul.f32 0.03125, %v1485_v41 }
 0x2f9   : > { %v1488_v4 = vsub.f32 %v1458_v33, %v1487_v3  ;;  %v1489_v34 = vsub.f32 %v1719_v35, %v1487_v3  ;;  %v1490_v32 = vsub.f32 %v1468_v39, %v1487_v3  ;;  %v1491_v29 = vsub.f32 %v1722_v17, %v1487_v3 }
 0x2fb   : > { %v1492_v62 = vmul.f32 %v1488_v4, %v1488_v4  ;;  %v1493_v25 = vmul.f32 %v1489_v34, %v1489_v34  ;;  %v1494_v11 = vmul.f32 %v1490_v32, %v1490_v32  ;;  %v1495_v63 = vmul.f32 %v1491_v29, %v1491_v29 }
 0x2fd   : > { %v1496_v22 = vadd.f32 %v1493_v25, %v1492_v62 }
 0x2ff   : > { %v1497_v24 = vadd.f32 %v1496_v22, %v1494_v11 }
 0x301   : > { %v1498_v45 = vadd.f32 %v1497_v24, %v1495_v63 }
 0x303   : > { %v1499_v14 = vrot.slane %v1498_v45, 4 }
 0x305   : > { %v1500_v42 = vadd.f32 %v1499_v14, %v1498_v45 }
 0x307   : > { %v1501_v47 = vrot.slane %v1500_v42, 2 }
 0x309   : > { %v1502_v26 = vadd.f32 %v1501_v47, %v1500_v42 }
 0x30b   : > { %v1503_v15 = vrot.slane %v1502_v26, 1 }
 0x30d   : > { %v1504_v49 = vadd.f32 %v1503_v15, %v1502_v26 }
 0x30f   : > { %v1505_v50 = vmul.f32 0.03125, %v1504_v49 }
 0x311   : > { %v1506_v20 = vadd.f32 1e-05, %v1505_v50 }
 0x313   : > { %2005 = vrsqrt.f32 %v1506_v20 }
 0x31d   : > { %v2006_v21 = vpop.eup %2005 }
 0x31e   : > { %v1508_v51 = vmul.f32 %v2006_v21, %v1488_v4  ;;  %v1510_v12 = vmul.f32 %v2006_v21, %v1490_v32  ;;  %v1511_v52 = vmul.f32 %v2006_v21, %v1491_v29  ;;  %v1509_v23 = vmul.f32 %v2006_v21, %v1489_v34 }
 0x320   : > { %v1536_v6 = vmul.f32 %v1519_v48, %v1508_v51  ;;  %v1538_v5 = vmul.f32 %v1529_v19, %v1510_v12  ;;  %v1539_v57 = vmul.f32 %v1534_v27, %v1511_v52  ;;  %v1537_v58 = vmul.f32 %v1524_v55, %v1509_v23 }
 0x322   : > { %v1567_v60 = vadd.f32 %v1562_v56, %v1539_v57  ;;  %v1565_v18 = vadd.f32 %v1552_v59, %v1537_v58  ;;  %v1564_v1 = vadd.f32 %v1547_v8, %v1536_v6  ;;  %v1566_v2 = vadd.f32 %v1557_v0, %v1538_v5 }
 0x324   : > { %1571 = vst [vmem:[%s2364_s29 + $0x18] sm:$0xff] %v1567_v60  ;;  %1569 = vst [vmem:[%s2364_s29 + $0x8] sm:$0xff] %v1565_v18 }
 0x325   : > { %1568 = vst [vmem:[%s2364_s29] sm:$0xff] %v1564_v1  ;;  %1570 = vst [vmem:[%s2364_s29 + $0x10] sm:$0xff] %v1566_v2 }
 0x326   : > { %2050 = shalt.err (!%p2047_p3)
}
 0x327   : > { %s2051_s29 = scalar_lea.hbm %s2948_s8, 512  ;;  %s2055_s9 = scalar_lea.hbm %s3021_s4, 2048 }
 0x328   : > { %p2052_p11 = scmp.ne.s32.totalorder %s2948_s8, %s2051_s29  ;;  %p2056_p8 = scmp.lt.u32.totalorder %s2948_s8, %s3021_s4 }
 0x329   : > { %p2057_p10 = scmp.lt.u32.totalorder %s2055_s9, %s2051_s29  ;;  %p2059_p7 = scmp.lt.u32.totalorder %s2051_s29, %s2948_s8 }
 0x32a   : > { %p2053_p13 = pnand %p2052_p11, %p3035_p2 }
 0x32b   : > { %p2058_p12 = por %p2057_p10, %p2056_p8 }
 0x32c   : > { %p2054_p5 = pneg %p2053_p13 }
 0x32d   : > { %p2060_p4 = por %p2059_p7, %p2058_p12 }
 0x32f   : > { %p2061_p0 = pnand %p2060_p4, %p2054_p5 }
 0x331   : > { %2064 = shalt.err (!%p2061_p0)
}
 0x332   : > { %s2180_s7 = smov 128   ;;  %s2181_s27 = smov 256  }
 0x333   : > { %s2182_s26 = smov 8  }
 0x334   : > { %1739 = dma.vmem_to_hbm [thread:$0]  (%p3035_p2), %s2943_s18, 512, %s2948_s8, %s2956_s10, %s2180_s7, %s2181_s27, %s2182_s26  }
 0x335 PF: > { %p1750_p1 = scmp.ge.s32.totalorder %s2159_s25, 2  ;;  %s1602_s6 = sand.u32 1, %s2119_s15  }
 0x336   : > { %p3036_p6 = scmp.ne.s32.totalorder %s3031_s14, 0  ;;  %s1603_s5 = scalar_lea.sflag [#allocation5], %s1602_s6 }
 0x338   : > { %p1746_p9 = pnand %p1750_p1, %p3036_p6 }
 0x33a   : > { %2114 = dma.done.wait (!%p1746_p9), %s1603_s5, 512  }
 0x33b   : > { %2116 = vsyncadd (!%p1746_p9), %s1603_s5, 4294966784  ;;  %s20_s25 = sadd.s32 1, %s2159_s25   ;;  %s3037_s11 = sld [smem:[#allocation9_spill]] }
 0x33c   : > { %p17_p3 = scmp.ge.s32.totalorder %s20_s25, 6   ;;  %s3038_s8 = sld [smem:[#allocation10_spill]] }
 0x33d   : > { %s3039_s15 = smov %s2123_s16  ;;  %s3040_s16 = smov %s2127_s17 }
 0x33e   : > { %s3041_s17 = smov %s2298_s13  ;;  %s3042_s18 = smov %s2135_s19 }
 0x33f   : > { %s3043_s19 = smov %s2139_s20  ;;  %s3044_s20 = smov %s2295_s12 }
 0x340   : > { %s3045_s21 = smov %s2151_s23  ;;  %s3046_s22 = smov %s2155_s24 }
 0x341   : > { %s3047_s23 = smov %s3037_s11  ;;  %19 = sbr.rel (!%p17_p3) target bundleno = 9 (0x9), region = 86 }
 0x342   : > { %s3048_s24 = smov %s3038_s8 }
 0x348   :  { %1608 = vsyncpa [#allocation4], 1 }
 0x349   :  { %1610 = vsyncpa [#allocation4 + $0x1], 1 }
 0x34a   :  { %1611 = vsyncpa [#allocation5], 1 }
 0x34b   :  { %1613 = vsyncpa [#allocation5 + $0x1], 1 }

</bundles_post_ra>
